<compile_context>
chip_gen: v6e
topology: v6e:2x2x1
jax: 0.10.0
libtpu: 0.0.40
codegen_flags: <defaults>
</compile_context>

<pallas_src>
import functools
import math

import jax
import jax.numpy as jnp
from jax.experimental import pallas as pl
from jax.experimental.pallas import tpu as pltpu


def _round_up(x, m):
    return (x + m - 1) // m * m


def concept_policy_kernel(x_ref, w_kc_ref, b_k_ref, wcls_ref, wcrit_ref,
                          bcrit_ref, out_ref):
    """Fused folded embedder + concept-attention actor + critic + log_softmax.

    x_ref     : [bt, C, T]  tokens, T = H*W on the lane axis
    w_kc_ref  : [K, C]      folded score weight  ((w_emb @ wq @ (concepts@wk)^T) * scale)^T
    b_k_ref   : [K, 1]      folded score bias
    wcls_ref  : [K, A]      concept -> class logits
    wcrit_ref : [1, C]      folded critic weight (w_emb @ wcrit)^T
    bcrit_ref : [1, 1]      folded critic bias
    out_ref   : [bt, 128]   packed output: [:, :A] = log-probs, [:, A] = value
    """
    x = x_ref[...].astype(jnp.float32)                    # [bt, C, T]
    bt, C, T = x.shape
    K = w_kc_ref.shape[0]
    A = wcls_ref.shape[1]

    # scores^T[b, k, t] = sum_c x[b, c, t] * w_kc[k, c] + b_k[k]
    # C is tiny (4): static-unrolled VPU broadcast-MACs, fully lane-dense over T.
    scores = jnp.broadcast_to(b_k_ref[...].reshape(1, K, 1), (bt, K, T))
    for c in range(C):
        scores = scores + x[:, c:c + 1, :] * w_kc_ref[:, c:c + 1][None]

    # Softmax over concepts (sublane axis K); normalize via EUP approx reciprocal.
    m = jnp.max(scores, axis=1, keepdims=True)            # [bt, 1, T]
    e = jnp.exp(scores - m)                                # [bt, K, T]
    denom = jnp.sum(e, axis=1, keepdims=True)              # [bt, 1, T]
    attn = e * pl.reciprocal(denom, approx=True)           # [bt, K, T]

    # mean over attn @ wcls == (mean over attn) @ wcls  ->  never build [B,T,A].
    attn_mean = jnp.mean(attn, axis=-1)                    # [bt, K]  (lane reduce)
    logits = jnp.dot(attn_mean, wcls_ref[...],
                     preferred_element_type=jnp.float32)   # [bt, A]  tiny matmul

    # log_softmax over actions (exact; Categorical(logits=probs) re-norm is idempotent).
    lm = jnp.max(logits, axis=-1, keepdims=True)
    sh = logits - lm
    logp = sh - jnp.log(jnp.sum(jnp.exp(sh), axis=-1, keepdims=True))

    # Critic, folded: v = mean_t(x) @ (w_emb @ wcrit) + (b_emb @ wcrit + bcrit).
    x_mean = jnp.mean(x, axis=-1)                          # [bt, C]
    v = jnp.sum(x_mean * wcrit_ref[...], axis=-1, keepdims=True) + bcrit_ref[...]

    # Lane-dense packed store (single unmasked vst per row).
    pad = jnp.zeros((bt, out_ref.shape[-1] - A - 1), jnp.float32)
    out_ref[...] = jnp.concatenate([logp, v, pad], axis=-1).astype(out_ref.dtype)


def init_params(key, *, in_channels, embed_dim, n_concepts, action_size):
    """Deterministic parameter construction (synthetic, not a checkpoint)."""
    ks = jax.random.split(key, 6)
    s = 1.0 / math.sqrt(embed_dim)
    return dict(
        w_emb=jax.random.normal(ks[0], (in_channels, embed_dim), jnp.float32)
        / math.sqrt(in_channels),
        b_emb=jnp.zeros((1, embed_dim), jnp.float32),
        concepts=jax.random.normal(ks[1], (n_concepts, embed_dim), jnp.float32) * s,
        wq=jax.random.normal(ks[2], (embed_dim, embed_dim), jnp.float32) * s,
        wk=jax.random.normal(ks[3], (embed_dim, embed_dim), jnp.float32) * s,
        wcls=jax.random.normal(ks[4], (n_concepts, action_size), jnp.float32)
        / math.sqrt(n_concepts),
        # orthogonal_init(nn.Linear(output_dim, 1), gain=1.0)
        wcrit=jax.nn.initializers.orthogonal(scale=1.0)(ks[5], (embed_dim, 1),
                                                        jnp.float32),
        bcrit=jnp.zeros((1, 1), jnp.float32),
    )


def concept_policy_forward(x_nchw, hx, masks, params, *, action_size,
                           block_b=128):
    """Mirrors ConceptPolicy.forward: returns (log_probs, v, hx).

    x_nchw: [B, C, H, W] (PyTorch NCHW convention).
    """
    del masks  # non-recurrent policy: masks unused in the forward compute
    B, C, H, W = x_nchw.shape
    T = H * W
    E = params["w_emb"].shape[1]
    K = params["concepts"].shape[0]
    A = action_size
    OUT_LANES = 128
    assert A + 1 <= OUT_LANES

    # ---- fold embedder + Q/K projections + critic into tiny matrices (once, in XLA) ----
    scale = 1.0 / math.sqrt(E)
    k_proj = params["concepts"] @ params["wk"]                       # [K, E]
    w_qk = params["wq"] @ k_proj.T                                   # [E, K]
    w_kc = ((params["w_emb"] @ w_qk) * scale).T                      # [K, C]
    b_k = ((params["b_emb"] @ w_qk) * scale).T                       # [K, 1]
    w_crit_row = (params["w_emb"] @ params["wcrit"]).T               # [1, C]
    b_crit = params["b_emb"] @ params["wcrit"] + params["bcrit"]     # [1, 1]

    # layout: NCHW -> [B, C, T] is a free reshape; T stays on the lane axis.
    x = x_nchw.reshape(B, C, T)

    # Batch tile: multiple of 8 sublanes; bounded VMEM per step (also fits v7x's 64 MiB).
    bt = _round_up(min(block_b, _round_up(B, 8)), 8)
    B_pad = _round_up(B, bt)
    if B_pad != B:
        x = jnp.pad(x, ((0, B_pad - B), (0, 0), (0, 0)))

    out = pl.pallas_call(
        concept_policy_kernel,
        out_shape=jax.ShapeDtypeStruct((B_pad, OUT_LANES), jnp.float32),
        grid=(B_pad // bt,),
        in_specs=[
            pl.BlockSpec((bt, C, T), lambda i: (i, 0, 0)),
            pl.BlockSpec((K, C), lambda i: (0, 0)),
            pl.BlockSpec((K, 1), lambda i: (0, 0)),
            pl.BlockSpec((K, A), lambda i: (0, 0)),
            pl.BlockSpec((1, C), lambda i: (0, 0)),
            pl.BlockSpec((1, 1), lambda i: (0, 0)),
        ],
        out_specs=pl.BlockSpec((bt, OUT_LANES), lambda i: (i, 0)),
        compiler_params=pltpu.CompilerParams(
            dimension_semantics=("parallel",)),
    )(x, w_kc, b_k, params["wcls"], w_crit_row, b_crit)

    logp = out[:B, :A]
    v = out[:B, A]
    # TODO(synk): torch.distributions.Categorical object has no Pallas equivalent;
    # we return its defining normalized log-probs instead.
    return logp, v, hx


def reference_forward(x_nchw, params):
    """Unfused pure-JAX reference of the same synthetic module (for validation)."""
    B, C, H, W = x_nchw.shape
    tokens = jnp.transpose(x_nchw, (0, 2, 3, 1)).reshape(B, H * W, C)
    hidden = jnp.einsum('btc,ce->bte', tokens, params['w_emb']) + params['b_emb'][None]
    c = jnp.mean(hidden, axis=1)
    q = jnp.einsum('bte,ef->btf', hidden, params['wq'])
    k = params['concepts'] @ params['wk']
    scores = jnp.einsum('bte,ke->btk', q, k) / math.sqrt(hidden.shape[-1])
    attn = jax.nn.softmax(scores, axis=-1)
    logits = jnp.mean(jnp.einsum('btk,ka->bta', attn, params['wcls']), axis=1)
    logp = jax.nn.log_softmax(logits, axis=-1)
    v = (c @ params['wcrit'] + params['bcrit']).reshape(-1)
    return logp, v


if __name__ == "__main__":
    key = jax.random.PRNGKey(0)
    k_x, k_p = jax.random.split(key, 2)

    # Small shapes consistent with the module's forward.
    B, C, H, W = 2, 4, 16, 16
    EMBED_DIM = 32     # embedder.embedding_size == embedder.output_dim
    N_CONCEPTS = 8
    ACTION_SIZE = 16

    x = jax.random.normal(k_x, (B, C, H, W), jnp.float32)
    hx = jnp.zeros((B, EMBED_DIM), jnp.float32)           # pass-through recurrent state
    masks = jnp.ones((B, 1), jnp.float32)

    params = init_params(k_p, in_channels=C, embed_dim=EMBED_DIM,
                         n_concepts=N_CONCEPTS, action_size=ACTION_SIZE)

    fwd = jax.jit(functools.partial(concept_policy_forward,
                                    action_size=ACTION_SIZE))
    log_probs, v, hx_out = fwd(x, hx, masks, params)
    jax.block_until_ready((log_probs, v, hx_out))

    # Sanity checks: shapes, normalization, and the algebraic folds vs. unfused reference.
    assert log_probs.shape == (B, ACTION_SIZE)
    assert v.shape == (B,)
    assert bool(jnp.allclose(jnp.sum(jnp.exp(log_probs), axis=1),
                             jnp.ones((B,)), atol=1e-4))
    ref_logp, ref_v = reference_forward(x, params)
    assert bool(jnp.allclose(log_probs, ref_logp, atol=1e-2, rtol=1e-2))
    assert bool(jnp.allclose(v, ref_v, atol=1e-3, rtol=1e-3))
    print("KERNEL_OK")
</pallas_src>

<mosaic_0001>
module attributes {stable_mosaic.version = 11 : i64} {
  func.func @concept_policy_kernel(%arg0: i32, %arg1: memref<8x4x256xf32, #tpu.memory_space<vmem>>, %arg2: memref<8x4xf32, #tpu.memory_space<vmem>>, %arg3: memref<8x1xf32, #tpu.memory_space<vmem>>, %arg4: memref<8x16xf32, #tpu.memory_space<vmem>>, %arg5: memref<1x4xf32, #tpu.memory_space<vmem>>, %arg6: memref<1x1xf32, #tpu.memory_space<vmem>>, %arg7: memref<8x128xf32, #tpu.memory_space<vmem>>) attributes {dimension_semantics = [#tpu.dimension_semantics<parallel>], iteration_bounds = array<i64: 1>, scalar_prefetch = 0 : i64, scratch_operands = 0 : i64, tpu.core_type = #tpu.core_type<tc>, window_params = [{transform_indices = @transform_0, window_bounds = array<i64: 8, 4, 256>}, {pipeline_mode = #tpu.pipeline_mode<synchronous>, transform_indices = @transform_1, window_bounds = array<i64: 8, 4>}, {pipeline_mode = #tpu.pipeline_mode<synchronous>, transform_indices = @transform_2, window_bounds = array<i64: 8, 1>}, {pipeline_mode = #tpu.pipeline_mode<synchronous>, transform_indices = @transform_3, window_bounds = array<i64: 8, 16>}, {pipeline_mode = #tpu.pipeline_mode<synchronous>, transform_indices = @transform_4, window_bounds = array<i64: 1, 4>}, {pipeline_mode = #tpu.pipeline_mode<synchronous>, transform_indices = @transform_5, window_bounds = array<i64: 1, 1>}, {transform_indices = @transform_6, window_bounds = array<i64: 8, 128>}]} {
    %c0 = arith.constant 0 : index
    %c0_0 = arith.constant 0 : index
    %c0_1 = arith.constant 0 : index
    %0 = vector.load %arg1[%c0, %c0_0, %c0_1] : memref<8x4x256xf32, #tpu.memory_space<vmem>>, vector<8x4x256xf32>
    %c0_2 = arith.constant 0 : index
    %c0_3 = arith.constant 0 : index
    %1 = vector.load %arg3[%c0_2, %c0_3] : memref<8x1xf32, #tpu.memory_space<vmem>>, vector<8x1xf32>
    %2 = vector.shape_cast %1 : vector<8x1xf32> to vector<1x8x1xf32>
    %3 = vector.shape_cast %2 : vector<1x8x1xf32> to vector<1x8x1xf32>
    %4 = vector.broadcast %3 : vector<1x8x1xf32> to vector<8x8x256xf32>
    %5 = vector.extract_strided_slice %0 {offsets = [0, 0, 0], sizes = [8, 1, 256], strides = [1, 1, 1]} : vector<8x4x256xf32> to vector<8x1x256xf32>
    %c0_4 = arith.constant 0 : index
    %c0_5 = arith.constant 0 : index
    %6 = vector.load %arg2[%c0_4, %c0_5] : memref<8x4xf32, #tpu.memory_space<vmem>>, vector<8x1xf32>
    %7 = vector.shape_cast %6 : vector<8x1xf32> to vector<1x8x1xf32>
    %8 = vector.broadcast %5 : vector<8x1x256xf32> to vector<8x8x256xf32>
    %9 = vector.broadcast %7 : vector<1x8x1xf32> to vector<8x8x256xf32>
    %10 = arith.mulf %8, %9 : vector<8x8x256xf32>
    %11 = arith.addf %4, %10 : vector<8x8x256xf32>
    %12 = vector.extract_strided_slice %0 {offsets = [0, 1, 0], sizes = [8, 1, 256], strides = [1, 1, 1]} : vector<8x4x256xf32> to vector<8x1x256xf32>
    %c0_6 = arith.constant 0 : index
    %c1 = arith.constant 1 : index
    %13 = vector.load %arg2[%c0_6, %c1] : memref<8x4xf32, #tpu.memory_space<vmem>>, vector<8x1xf32>
    %14 = vector.shape_cast %13 : vector<8x1xf32> to vector<1x8x1xf32>
    %15 = vector.broadcast %12 : vector<8x1x256xf32> to vector<8x8x256xf32>
    %16 = vector.broadcast %14 : vector<1x8x1xf32> to vector<8x8x256xf32>
    %17 = arith.mulf %15, %16 : vector<8x8x256xf32>
    %18 = arith.addf %11, %17 : vector<8x8x256xf32>
    %19 = vector.extract_strided_slice %0 {offsets = [0, 2, 0], sizes = [8, 1, 256], strides = [1, 1, 1]} : vector<8x4x256xf32> to vector<8x1x256xf32>
    %c0_7 = arith.constant 0 : index
    %c2 = arith.constant 2 : index
    %20 = vector.load %arg2[%c0_7, %c2] : memref<8x4xf32, #tpu.memory_space<vmem>>, vector<8x1xf32>
    %21 = vector.shape_cast %20 : vector<8x1xf32> to vector<1x8x1xf32>
    %22 = vector.broadcast %19 : vector<8x1x256xf32> to vector<8x8x256xf32>
    %23 = vector.broadcast %21 : vector<1x8x1xf32> to vector<8x8x256xf32>
    %24 = arith.mulf %22, %23 : vector<8x8x256xf32>
    %25 = arith.addf %18, %24 : vector<8x8x256xf32>
    %26 = vector.extract_strided_slice %0 {offsets = [0, 3, 0], sizes = [8, 1, 256], strides = [1, 1, 1]} : vector<8x4x256xf32> to vector<8x1x256xf32>
    %c0_8 = arith.constant 0 : index
    %c3 = arith.constant 3 : index
    %27 = vector.load %arg2[%c0_8, %c3] : memref<8x4xf32, #tpu.memory_space<vmem>>, vector<8x1xf32>
    %28 = vector.shape_cast %27 : vector<8x1xf32> to vector<1x8x1xf32>
    %29 = vector.broadcast %26 : vector<8x1x256xf32> to vector<8x8x256xf32>
    %30 = vector.broadcast %28 : vector<1x8x1xf32> to vector<8x8x256xf32>
    %31 = arith.mulf %29, %30 : vector<8x8x256xf32>
    %32 = arith.addf %25, %31 : vector<8x8x256xf32>
    %cst = arith.constant dense<0xFF800000> : vector<8x256xf32>
    %33 = vector.multi_reduction <maximumf>, %32, %cst [1] : vector<8x8x256xf32> to vector<8x256xf32>
    %34 = vector.shape_cast %33 : vector<8x256xf32> to vector<8x1x256xf32>
    %35 = vector.broadcast %34 : vector<8x1x256xf32> to vector<8x8x256xf32>
    %36 = arith.subf %32, %35 : vector<8x8x256xf32>
    %37 = math.exp %36 : vector<8x8x256xf32>
    %cst_9 = arith.constant dense<0.000000e+00> : vector<8x256xf32>
    %38 = vector.multi_reduction <add>, %37, %cst_9 [1] : vector<8x8x256xf32> to vector<8x256xf32>
    %39 = vector.shape_cast %38 : vector<8x256xf32> to vector<8x1x256xf32>
    %40 = tpu.reciprocal %39 {approx = true} : vector<8x1x256xf32> -> vector<8x1x256xf32>
    %41 = vector.broadcast %40 : vector<8x1x256xf32> to vector<8x8x256xf32>
    %42 = arith.mulf %37, %41 : vector<8x8x256xf32>
    %cst_10 = arith.constant dense<0.000000e+00> : vector<8x8xf32>
    %43 = vector.multi_reduction <add>, %42, %cst_10 [2] : vector<8x8x256xf32> to vector<8x8xf32>
    %cst_11 = arith.constant 2.560000e+02 : f32
    %44 = vector.broadcast %cst_11 : f32 to vector<8x8xf32>
    %45 = arith.divf %43, %44 : vector<8x8xf32>
    %c0_12 = arith.constant 0 : index
    %c0_13 = arith.constant 0 : index
    %46 = vector.load %arg4[%c0_12, %c0_13] : memref<8x16xf32, #tpu.memory_space<vmem>>, vector<8x16xf32>
    %cst_14 = arith.constant dense<0.000000e+00> : vector<8x16xf32>
    %47 = tpu.matmul %45, %46, %cst_14 {dimension_numbers = #tpu.dot_dimension_numbers<[1], [0], [0], [1], [0, 0, 1, 1], [], []>} : vector<8x8xf32>, vector<8x16xf32>, vector<8x16xf32> -> vector<8x16xf32>
    %cst_15 = arith.constant dense<0xFF800000> : vector<8xf32>
    %48 = vector.multi_reduction <maximumf>, %47, %cst_15 [1] : vector<8x16xf32> to vector<8xf32>
    %49 = vector.shape_cast %48 : vector<8xf32> to vector<8x1xf32>
    %50 = vector.broadcast %49 : vector<8x1xf32> to vector<8x16xf32>
    %51 = arith.subf %47, %50 : vector<8x16xf32>
    %52 = math.exp %51 : vector<8x16xf32>
    %cst_16 = arith.constant dense<0.000000e+00> : vector<8xf32>
    %53 = vector.multi_reduction <add>, %52, %cst_16 [1] : vector<8x16xf32> to vector<8xf32>
    %54 = vector.shape_cast %53 : vector<8xf32> to vector<8x1xf32>
    %55 = math.log %54 : vector<8x1xf32>
    %56 = vector.broadcast %55 : vector<8x1xf32> to vector<8x16xf32>
    %57 = arith.subf %51, %56 : vector<8x16xf32>
    %cst_17 = arith.constant dense<0.000000e+00> : vector<8x4xf32>
    %58 = vector.multi_reduction <add>, %0, %cst_17 [2] : vector<8x4x256xf32> to vector<8x4xf32>
    %cst_18 = arith.constant 2.560000e+02 : f32
    %59 = vector.broadcast %cst_18 : f32 to vector<8x4xf32>
    %60 = arith.divf %58, %59 : vector<8x4xf32>
    %c0_19 = arith.constant 0 : index
    %c0_20 = arith.constant 0 : index
    %61 = vector.load %arg5[%c0_19, %c0_20] : memref<1x4xf32, #tpu.memory_space<vmem>>, vector<1x4xf32>
    %62 = vector.broadcast %61 : vector<1x4xf32> to vector<8x4xf32>
    %63 = arith.mulf %60, %62 : vector<8x4xf32>
    %cst_21 = arith.constant dense<0.000000e+00> : vector<8xf32>
    %64 = vector.multi_reduction <add>, %63, %cst_21 [1] : vector<8x4xf32> to vector<8xf32>
    %65 = vector.shape_cast %64 : vector<8xf32> to vector<8x1xf32>
    %c0_22 = arith.constant 0 : index
    %c0_23 = arith.constant 0 : index
    %66 = vector.load %arg6[%c0_22, %c0_23] : memref<1x1xf32, #tpu.memory_space<vmem>>, vector<1x1xf32>
    %67 = vector.broadcast %66 : vector<1x1xf32> to vector<8x1xf32>
    %68 = arith.addf %65, %67 : vector<8x1xf32>
    %cst_24 = arith.constant 0.000000e+00 : f32
    %69 = vector.broadcast %cst_24 : f32 to vector<8x111xf32>
    %70 = tpu.concatenate %57, %68, %69 in 1 : vector<8x16xf32>, vector<8x1xf32>, vector<8x111xf32> -> vector<8x128xf32>
    %c0_25 = arith.constant 0 : index
    %c0_26 = arith.constant 0 : index
    %71 = vector.load %arg7[%c0_25, %c0_26] : memref<8x128xf32, #tpu.memory_space<vmem>>, vector<8x128xf32>
    tpu.vector_store %arg7[%c0_25, %c0_26], %70 {strides = array<i32>} : memref<8x128xf32, #tpu.memory_space<vmem>>, vector<8x128xf32>,
    return
  }
  func.func @transform_0(%arg0: i32) -> (i32, i32, i32) {
    %c0_i32 = arith.constant 0 : i32
    %c0_i32_0 = arith.constant 0 : i32
    %c0_i32_1 = arith.constant 0 : i32
    return %arg0, %c0_i32, %c0_i32_0 : i32, i32, i32
  }
  func.func @transform_1(%arg0: i32) -> (i32, i32) {
    %c0_i32 = arith.constant 0 : i32
    %c0_i32_0 = arith.constant 0 : i32
    %c0_i32_1 = arith.constant 0 : i32
    return %c0_i32, %c0_i32_0 : i32, i32
  }
  func.func @transform_2(%arg0: i32) -> (i32, i32) {
    %c0_i32 = arith.constant 0 : i32
    %c0_i32_0 = arith.constant 0 : i32
    %c0_i32_1 = arith.constant 0 : i32
    return %c0_i32, %c0_i32_0 : i32, i32
  }
  func.func @transform_3(%arg0: i32) -> (i32, i32) {
    %c0_i32 = arith.constant 0 : i32
    %c0_i32_0 = arith.constant 0 : i32
    %c0_i32_1 = arith.constant 0 : i32
    return %c0_i32, %c0_i32_0 : i32, i32
  }
  func.func @transform_4(%arg0: i32) -> (i32, i32) {
    %c0_i32 = arith.constant 0 : i32
    %c0_i32_0 = arith.constant 0 : i32
    %c0_i32_1 = arith.constant 0 : i32
    return %c0_i32, %c0_i32_0 : i32, i32
  }
  func.func @transform_5(%arg0: i32) -> (i32, i32) {
    %c0_i32 = arith.constant 0 : i32
    %c0_i32_0 = arith.constant 0 : i32
    %c0_i32_1 = arith.constant 0 : i32
    return %c0_i32, %c0_i32_0 : i32, i32
  }
  func.func @transform_6(%arg0: i32) -> (i32, i32) {
    %c0_i32 = arith.constant 0 : i32
    %c0_i32_0 = arith.constant 0 : i32
    return %arg0, %c0_i32 : i32, i32
  }
}

</mosaic_0001>

<bundles_post_ra>
// kernel: concept_policy_forward.1
= control target key start
LH: loop header
LB: loop body
LE: loop exit
PB: predicated region body
PF: predicated region fallthrough
CT: control target
= control target key end

     0   :  { %v1502_v0 = vmov 0   ;;  %v1503_v1 = vmov 1   ;;  %v1504_v4 = vmov 2   ;;  %v1505_v5 = vmov 3   ;;  %s1508_s30 = smov 16   ;;  %s2244_s1 = inlined_call_operand.vmem [shape: f32[8,4], index: 1, kind: input, shape index: {}]   ;;  %s2245_s2 = inlined_call_operand.vmem [shape: f32[8,1], index: 2, kind: input, shape index: {}]   ;;  %s2246_s0 = inlined_call_operand.vmem [shape: f32[8,4,256], index: 0, kind: input, shape index: {}]   ;;  %s2247_s3 = inlined_call_operand.vmem [shape: f32[8,16], index: 3, kind: input, shape index: {}]   ;;  %s2248_s4 = inlined_call_operand.vmem [shape: f32[1,4], index: 4, kind: input, shape index: {}]   ;;  %s2249_s5 = inlined_call_operand.<no memory space> [shape: f32[1,1], index: 5, kind: input, shape index: {}]   ;;  %s2250_s6 = inlined_call_operand.vmem [shape: f32[8,128], index: 6, kind: output, shape index: {}]  }
   0x1   :  { %1413 = vset.pattern.permute.xlu0 %v1502_v0  ;;  %1414 = vset.pattern.permute.xlu1 %v1503_v1  ;;  %v39_v2 = vld [vmem:[%s2244_s1] sm:$0xff]  ;;  %v2251_v6 = vlaneseq  ;;  %v1559_v9 = vld [vmem:[%s2246_s0 + $0x30] sm:$0xff]  ;;  %v26_v21 = vld [vmem:[%s2246_s0 + $0x8] sm:$0xff]  ;;  %vm1233_vm0 = vcmask 1043456   ;;  %vm1507_vm1 = vmmov 0   ;;  %vm1117_vm2 = vcmask 1041409  }
   0x2   :  { %194 = vperm.xlu0 %1413, %v39_v2   ;;  %374 = vperm.xlu1 %1414, %v39_v2   ;;  %v33_v3 = vld [vmem:[%s2245_s2] sm:$0xff]  ;;  %v28_v43 = vld [vmem:[%s2246_s0 + $0x18] sm:$0xff]  ;;  %v27_v56 = vld [vmem:[%s2246_s0 + $0x10] sm:$0xff]  ;;  %vm1119_vm3 = vcmask 1042434   ;;  %vm1121_vm4 = vcmask 1043459   ;;  %vm1123_vm5 = vcmask 1044484  }
   0x3   :  { %v1551_v7 = vshrl.u32 %v2251_v6, 7  ;;  %v25_v25 = vld [vmem:[%s2246_s0] sm:$0xff]  ;;  %vm1125_vm6 = vcmask 1045509   ;;  %vm1127_vm7 = vcmask 1046534   ;;  %vm1129_vm8 = vcmask 1047559  }
   0x4   :  { %vm1131_vm9 = vcmask 64512   ;;  %vm1372_vm10 = vcmask 31744   ;;  %vm1204_vm11 = vcmask 130048   ;;  %vm1389_vm12 = vcmask 138240  }
   0x5   :  { %2255 = vst [vmem:[#allocation3_spill] sm:$0xff] %v1551_v7  ;;  %v1554_v8 = vsub.s32 4, %v1551_v7  ;;  %v1562_v10 = vsub.s32 0, %v1551_v7  ;;  %v1570_v13 = vsub.s32 5, %v1551_v7  ;;  %v1573_v14 = vsub.s32 1, %v1551_v7 }
   0x6   :  { %36 = vperm.xlu0 %1413, %v33_v3   ;;  %1415 = vset.pattern.permute.xlu1 %v1504_v4  ;;  %v1578_v16 = vsub.s32 6, %v1551_v7  ;;  %v1584_v18 = vsub.s32 2, %v1551_v7  ;;  %v1595_v22 = vsub.s32 3, %v1551_v7  ;;  %v1598_v23 = vsub.s32 7, %v1551_v7 }
   0x7   :  { %554 = vperm.xlu1 %1415, %v39_v2   ;;  %v103_v11 = vrot.slane %v1559_v9, %v1554_v8  ;;  %v284_v15 = vrot.slane %v1559_v9, %v1570_v13  ;;  %v59_v24 = vrot.slane %v26_v21, %v1562_v10  ;;  %v63_v26 = vrot.slane %v26_v21, %v1554_v8 }
   0x8   :  { %v464_v19 = vrot.slane %v1559_v9, %v1578_v16  ;;  %v240_v27 = vrot.slane %v26_v21, %v1573_v14  ;;  %v244_v28 = vrot.slane %v26_v21, %v1570_v13  ;;  %v420_v29 = vrot.slane %v26_v21, %v1584_v18 }
   0x9   :  { %v1567_v12 = vrot.slane %v103_v11, %v1562_v10  ;;  %v1581_v17 = vrot.slane %v284_v15, %v1573_v14  ;;  %v424_v30 = vrot.slane %v26_v21, %v1578_v16  ;;  %v600_v31 = vrot.slane %v26_v21, %v1595_v22 }
   0xa   :  { %1416 = vset.pattern.permute.xlu0 %v1505_v5  ;;  %v1589_v20 = vrot.slane %v464_v19, %v1584_v18  ;;  %v604_v32 = vrot.slane %v26_v21, %v1598_v23  ;;  %v51_v33 = vrot.slane %v25_v25, %v1562_v10  ;;  %v55_v34 = vrot.slane %v25_v25, %v1554_v8 }
   0xb   :  { %734 = vperm.xlu0 %1416, %v39_v2   ;;  %1418 = vset.pattern.permute.xlu1 %v1502_v0  ;;  %2256 = vst [vmem:[#allocation4_spill] sm:$0xff] %v1567_v12  ;;  %2257 = vst [vmem:[#allocation5_spill] sm:$0xff] %v1581_v17  ;;  %v1614_v35 = vrot.slane %v59_v24, %v1562_v10  ;;  %v232_v36 = vrot.slane %v25_v25, %v1573_v14 }
   0xc   :  { %2258 = vst [vmem:[#allocation6_spill] sm:$0xff] %v1589_v20  ;;  %v236_v37 = vrot.slane %v25_v25, %v1570_v13  ;;  %v412_v38 = vrot.slane %v25_v25, %v1584_v18  ;;  %v1620_v39 = vrot.slane %v63_v26, %v1562_v10  ;;  %v1623_v40 = vrot.slane %v240_v27, %v1573_v14  ;;  %v30_v27 = vld [vmem:[%s2246_s0 + $0x28] sm:$0xff] }
   0xd   :  { %v1626_v41 = vrot.slane %v244_v28, %v1573_v14  ;;  %v1629_v42 = vrot.slane %v420_v29, %v1584_v18  ;;  %v1635_v44 = vrot.slane %v424_v30, %v1584_v18  ;;  %v1638_v45 = vrot.slane %v600_v31, %v1595_v22 }
   0xe   :  { %v1641_v46 = vrot.slane %v604_v32, %v1595_v22  ;;  %v416_v47 = vrot.slane %v25_v25, %v1578_v16  ;;  %v1645_v48 = vrot.slane %v51_v33, %v1562_v10  ;;  %v1648_v49 = vrot.slane %v55_v34, %v1562_v10  ;;  %v29_v32 = vld [vmem:[%s2246_s0 + $0x20] sm:$0xff] }
   0xf   :  { %1417 = vset.pattern.permute.xlu0 %v1502_v0  ;;  %v592_v50 = vrot.slane %v25_v25, %v1595_v22  ;;  %v596_v51 = vrot.slane %v25_v25, %v1598_v23  ;;  %v1653_v52 = vrot.slane %v232_v36, %v1573_v14  ;;  %v1656_v53 = vrot.slane %v236_v37, %v1573_v14 }
  0x10   :  { %v1659_v54 = vrot.slane %v412_v38, %v1584_v18  ;;  %v75_v55 = vrot.slane %v28_v43, %v1562_v10  ;;  %v79_v57 = vrot.slane %v28_v43, %v1554_v8  ;;  %v256_v58 = vrot.slane %v28_v43, %v1573_v14 }
  0x11   :  { %v260_v59 = vrot.slane %v28_v43, %v1570_v13  ;;  %v436_v60 = vrot.slane %v28_v43, %v1584_v18  ;;  %v1670_v61 = vrot.slane %v416_v47, %v1584_v18  ;;  %v440_v62 = vrot.slane %v28_v43, %v1578_v16 }
  0x12   :  { %v616_v63 = vrot.slane %v28_v43, %v1595_v22  ;;  %v620_v0 = vrot.slane %v28_v43, %v1598_v23  ;;  %v1676_v1 = vrot.slane %v592_v50, %v1595_v22  ;;  %v1679_v2 = vrot.slane %v596_v51, %v1595_v22 }
  0x13   :  { %v67_v3 = vrot.slane %v27_v56, %v1562_v10  ;;  %v71_v4 = vrot.slane %v27_v56, %v1554_v8  ;;  %v1684_v5 = vrot.slane %v75_v55, %v1562_v10  ;;  %v248_v11 = vrot.slane %v27_v56, %v1573_v14 }
  0x14   :  { %v252_v15 = vrot.slane %v27_v56, %v1570_v13  ;;  %v428_v19 = vrot.slane %v27_v56, %v1584_v18  ;;  %v1690_v21 = vrot.slane %v79_v57, %v1562_v10  ;;  %v1693_v24 = vrot.slane %v256_v58, %v1573_v14 }
  0x15   :  { %v1696_v25 = vrot.slane %v260_v59, %v1573_v14  ;;  %v1699_v26 = vrot.slane %v436_v60, %v1584_v18  ;;  %v1705_v28 = vrot.slane %v440_v62, %v1584_v18  ;;  %v1708_v29 = vrot.slane %v616_v63, %v1595_v22 }
  0x16   :  { %v1711_v30 = vrot.slane %v620_v0, %v1595_v22  ;;  %v432_v31 = vrot.slane %v27_v56, %v1578_v16  ;;  %v1718_v33 = vrot.slane %v67_v3, %v1562_v10  ;;  %v1721_v34 = vrot.slane %v71_v4, %v1562_v10 }
  0x17   :  { %v608_v36 = vrot.slane %v27_v56, %v1595_v22  ;;  %v612_v37 = vrot.slane %v27_v56, %v1598_v23  ;;  %v1726_v38 = vrot.slane %v248_v11, %v1573_v14  ;;  %v1729_v43 = vrot.slane %v252_v15, %v1573_v14 }
  0x18   :  { %v1732_v47 = vrot.slane %v428_v19, %v1584_v18  ;;  %v91_v50 = vrot.slane %v30_v27, %v1562_v10  ;;  %v95_v51 = vrot.slane %v30_v27, %v1554_v8  ;;  %v272_v55 = vrot.slane %v30_v27, %v1573_v14 }
  0x19   :  { %v276_v57 = vrot.slane %v30_v27, %v1570_v13  ;;  %v83_v58 = vrot.slane %v29_v32, %v1562_v10  ;;  %v452_v56 = vrot.slane %v30_v27, %v1584_v18  ;;  %v456_v59 = vrot.slane %v30_v27, %v1578_v16 }
  0x1a   :  { %v87_v60 = vrot.slane %v29_v32, %v1554_v8  ;;  %v264_v62 = vrot.slane %v29_v32, %v1573_v14  ;;  %v1744_v63 = vrot.slane %v432_v31, %v1584_v18  ;;  %v632_v0 = vrot.slane %v30_v27, %v1595_v22 }
  0x1b   :  { %v636_v3 = vrot.slane %v30_v27, %v1598_v23  ;;  %v268_v4 = vrot.slane %v29_v32, %v1570_v13  ;;  %v1750_v11 = vrot.slane %v608_v36, %v1595_v22  ;;  %v1753_v15 = vrot.slane %v612_v37, %v1595_v22  ;;  %v1774_v37 = vld [vmem:[%s2246_s0 + $0x38] sm:$0xff] }
  0x1c   :  { %v1756_v19 = vrot.slane %v91_v50, %v1562_v10  ;;  %v444_v6 = vrot.slane %v29_v32, %v1584_v18  ;;  %v1760_v31 = vrot.slane %v95_v51, %v1562_v10  ;;  %v1763_v7 = vrot.slane %v272_v55, %v1573_v14  ;;  %2260 = vst [vmem:[#allocation8_spill] sm:$0xff] %v1774_v37 }
  0x1d   :  { %v1766_v27 = vrot.slane %v276_v57, %v1573_v14  ;;  %v1769_v36 = vrot.slane %v83_v58, %v1562_v10  ;;  %v1777_v50 = vrot.slane %v452_v56, %v1584_v18  ;;  %v1780_v51 = vrot.slane %v456_v59, %v1584_v18 }
  0x1e   :  { %v1783_v55 = vrot.slane %v87_v60, %v1562_v10  ;;  %v1786_v57 = vrot.slane %v264_v62, %v1573_v14  ;;  %v1789_v58 = vrot.slane %v632_v0, %v1595_v22  ;;  %v1792_v20 = vrot.slane %v636_v3, %v1595_v22 }
  0x1f   :  { %2259 = vst [vmem:[#allocation7_spill] sm:$0xff] %v1769_v36  ;;  %2261 = vst [vmem:[#allocation9_spill] sm:$0xff] %v1777_v50  ;;  %v1795_v17 = vrot.slane %v268_v4, %v1573_v14  ;;  %v448_v56 = vrot.slane %v29_v32, %v1578_v16  ;;  %v1799_v59 = vrot.slane %v444_v6, %v1584_v18 }
  0x20   :  { %2262 = vst [vmem:[#allocation10_spill] sm:$0xff] %v1780_v51  ;;  %2263 = vst [vmem:[#allocation11_spill] sm:$0xff] %v1783_v55  ;;  %v624_v60 = vrot.slane %v29_v32, %v1595_v22  ;;  %v107_v62 = vrot.slane %v1774_v37, %v1562_v10  ;;  %v111_v0 = vrot.slane %v1774_v37, %v1554_v8 }
  0x21   :  { %2264 = vst [vmem:[#allocation12_spill] sm:$0xff] %v1786_v57  ;;  %2265 = vst [vmem:[#allocation13_spill] sm:$0xff] %v1789_v58  ;;  %v628_v12 = vrot.slane %v29_v32, %v1598_v23  ;;  %v288_v3 = vrot.slane %v1774_v37, %v1573_v14  ;;  %v292_v4 = vrot.slane %v1774_v37, %v1570_v13 }
  0x22   :  { %2266 = vst [vmem:[#allocation14_spill] sm:$0xff] %v1792_v20  ;;  %2267 = vst [vmem:[#allocation15_spill] sm:$0xff] %v1795_v17  ;;  %v99_v6 = vrot.slane %v1559_v9, %v1562_v10  ;;  %v472_v17 = vrot.slane %v1774_v37, %v1578_v16  ;;  %v648_v8 = vrot.slane %v1774_v37, %v1595_v22 }
  0x23   :  { %2268 = vst [vmem:[#allocation16_spill] sm:$0xff] %v1799_v59  ;;  %v468_v59 = vrot.slane %v1774_v37, %v1584_v18  ;;  %v652_v32 = vrot.slane %v1774_v37, %v1598_v23  ;;  %v280_v57 = vrot.slane %v1559_v9, %v1573_v14  ;;  %v460_v13 = vrot.slane %v1559_v9, %v1584_v18 }
  0x24   :  { %v640_v55 = vrot.slane %v1559_v9, %v1595_v22  ;;  %v644_v36 = vrot.slane %v1559_v9, %v1598_v23  ;;  %v1830_v16 = vrot.slane %v448_v56, %v1584_v18  ;;  %v1833_v20 = vrot.slane %v624_v60, %v1595_v22 }
  0x25   :  { %v1836_v37 = vrot.slane %v107_v62, %v1562_v10  ;;  %v1839_v58 = vrot.slane %v111_v0, %v1562_v10  ;;  %v1842_v51 = vrot.slane %v628_v12, %v1595_v22  ;;  %v1845_v50 = vrot.slane %v288_v3, %v1573_v14 }
  0x26   :  { %v1848_v9 = vrot.slane %v292_v4, %v1573_v14  ;;  %v1851_v23 = vrot.slane %v99_v6, %v1562_v10  ;;  %v1854_v56 = vrot.slane %v468_v59, %v1584_v18  ;;  %v1857_v60 = vrot.slane %v472_v17, %v1584_v18 }
  0x27   :  { %v1860_v62 = vrot.slane %v648_v8, %v1595_v22  ;;  %v1863_v12 = vrot.slane %v652_v32, %v1595_v22  ;;  %v1870_v4 = vrot.slane %v280_v57, %v1573_v14  ;;  %v1873_v10 = vrot.slane %v460_v13, %v1584_v18 }
  0x28   :  { %2269 = vst [vmem:[#allocation17_spill] sm:$0xff] %v1851_v23  ;;  %v1876_v59 = vrot.slane %v640_v55, %v1595_v22  ;;  %v1879_v17 = vrot.slane %v644_v36, %v1595_v22 }
  0x29   :  { %2270 = vst [vmem:[#allocation18_spill] sm:$0xff] %v1870_v4  ;;  %2271 = vst [vmem:[#allocation19_spill] sm:$0xff] %v1873_v10 }
  0x2a   :  { %2272 = vst [vmem:[#allocation20_spill] sm:$0xff] %v1876_v59  ;;  %2273 = vst [vmem:[#allocation21_spill] sm:$0xff] %v1879_v17 }
  0x7d   :  { %v1865_v0 = vpop.permute.xlu0 %194  ;;  %v1867_v3 = vpop.permute.xlu1 %374 }
  0x7e   :  { %v199_v6 = vmul.f32 %v1865_v0, %v1614_v35  ;;  %v200_v8 = vmul.f32 %v1865_v0, %v1620_v39  ;;  %v379_v32 = vmul.f32 %v1867_v3, %v1623_v40  ;;  %v380_v14 = vmul.f32 %v1867_v3, %v1626_v41 }
  0x7f   :  { %v197_v18 = vmul.f32 %v1865_v0, %v1645_v48  ;;  %v198_v55 = vmul.f32 %v1865_v0, %v1648_v49  ;;  %v377_v22 = vmul.f32 %v1867_v3, %v1653_v52  ;;  %v378_v35 = vmul.f32 %v1867_v3, %v1656_v53 }
  0x80   :  { %v203_v39 = vmul.f32 %v1865_v0, %v1684_v5  ;;  %v204_v40 = vmul.f32 %v1865_v0, %v1690_v21  ;;  %v383_v41 = vmul.f32 %v1867_v3, %v1693_v24  ;;  %v384_v48 = vmul.f32 %v1867_v3, %v1696_v25 }
  0x81   :  { %v1905_v36 = vpop.permute.xlu0 %36  ;;  %v201_v49 = vmul.f32 %v1865_v0, %v1718_v33  ;;  %v202_v52 = vmul.f32 %v1865_v0, %v1721_v34  ;;  %v381_v53 = vmul.f32 %v1867_v3, %v1726_v38  ;;  %v382_v5 = vmul.f32 %v1867_v3, %v1729_v43 }
  0x82   :  { %v1915_v21 = vpop.permute.xlu1 %554  ;;  %v215_v24 = vadd.f32 %v199_v6, %v1905_v36  ;;  %v216_v25 = vadd.f32 %v200_v8, %v1905_v36  ;;  %v213_v57 = vadd.f32 %v197_v18, %v1905_v36  ;;  %v214_v13 = vadd.f32 %v198_v55, %v1905_v36 }
  0x83   :  { %v559_v33 = vmul.f32 %v1915_v21, %v1629_v42  ;;  %v560_v34 = vmul.f32 %v1915_v21, %v1635_v44  ;;  %v557_v38 = vmul.f32 %v1915_v21, %v1659_v54  ;;  %v558_v43 = vmul.f32 %v1915_v21, %v1670_v61 }
  0x84   :  { %v395_v17 = vadd.f32 %v379_v32, %v215_v24  ;;  %v396_v6 = vadd.f32 %v380_v14, %v216_v25  ;;  %v393_v59 = vadd.f32 %v377_v22, %v213_v57  ;;  %v394_v8 = vadd.f32 %v378_v35, %v214_v13 }
  0x85   :  { %v219_v18 = vadd.f32 %v203_v39, %v1905_v36  ;;  %v220_v55 = vadd.f32 %v204_v40, %v1905_v36  ;;  %v563_v42 = vmul.f32 %v1915_v21, %v1699_v26  ;;  %v564_v44 = vmul.f32 %v1915_v21, %v1705_v28 }
  0x86   :  { %v1935_v10 = vpop.permute.xlu0 %734  ;;  %v575_v54 = vadd.f32 %v559_v33, %v395_v17  ;;  %v576_v4 = vadd.f32 %v560_v34, %v396_v6  ;;  %v573_v23 = vadd.f32 %v557_v38, %v393_v59  ;;  %v574_v61 = vadd.f32 %v558_v43, %v394_v8 }
  0x87   :  { %v739_v32 = vmul.f32 %v1935_v10, %v1638_v45  ;;  %v740_v14 = vmul.f32 %v1935_v10, %v1641_v46  ;;  %v737_v22 = vmul.f32 %v1935_v10, %v1676_v1  ;;  %v738_v26 = vmul.f32 %v1935_v10, %v1679_v2 }
  0x88   :  { %v399_v35 = vadd.f32 %v383_v41, %v219_v18  ;;  %v400_v28 = vadd.f32 %v384_v48, %v220_v55  ;;  %v743_v17 = vmul.f32 %v1935_v10, %v1708_v29  ;;  %v744_v59 = vmul.f32 %v1935_v10, %v1711_v30 }
  0x89   :  { %v1949_v39 = vadd.f32 %v739_v32, %v575_v54  ;;  %v1951_v45 = vadd.f32 %v740_v14, %v576_v4  ;;  %v1953_v40 = vadd.f32 %v737_v22, %v573_v23  ;;  %v1955_v46 = vadd.f32 %v738_v26, %v574_v61 }
  0x8a   :  { %v579_v1 = vadd.f32 %v563_v42, %v399_v35  ;;  %v580_v24 = vadd.f32 %v564_v44, %v400_v28  ;;  %v217_v2 = vadd.f32 %v201_v49, %v1905_v36  ;;  %v218_v41 = vadd.f32 %v202_v52, %v1905_v36 }
  0x8b   :  { %v781_v48 = vrot.slane %v1949_v39, 4  ;;  %v787_v29 = vrot.slane %v1951_v45, 4  ;;  %v769_v30 = vrot.slane %v1953_v40, 4  ;;  %v775_v25 = vrot.slane %v1955_v46, 4 }
  0x8c   :  { %v1963_v4 = vadd.f32 %v743_v17, %v579_v1  ;;  %v1965_v23 = vadd.f32 %v744_v59, %v580_v24  ;;  %v397_v57 = vadd.f32 %v381_v53, %v217_v2  ;;  %v398_v13 = vadd.f32 %v382_v5, %v218_v41 }
  0x8d   :  { %v782_v33 = vmax.f32 %v1949_v39, %v781_v48  ;;  %v788_v49 = vmax.f32 %v1951_v45, %v787_v29  ;;  %v770_v52 = vmax.f32 %v1953_v40, %v769_v30  ;;  %v776_v34 = vmax.f32 %v1955_v46, %v775_v25 }
  0x8e   :  { %v805_v38 = vrot.slane %v1963_v4, 4  ;;  %v811_v43 = vrot.slane %v1965_v23, 4  ;;  %v561_v6 = vmul.f32 %v1915_v21, %v1732_v47  ;;  %v562_v8 = vmul.f32 %v1915_v21, %v1744_v63 }
  0x8f   :  { %v783_v53 = vrot.slane %v782_v33, 2  ;;  %v789_v5 = vrot.slane %v788_v49, 2  ;;  %v771_v18 = vrot.slane %v770_v52, 2  ;;  %v777_v55 = vrot.slane %v776_v34, 2 }
  0x90   :  { %v806_v42 = vmax.f32 %v1963_v4, %v805_v38  ;;  %v812_v44 = vmax.f32 %v1965_v23, %v811_v43  ;;  %v577_v54 = vadd.f32 %v561_v6, %v397_v57  ;;  %v578_v61 = vadd.f32 %v562_v8, %v398_v13 }
  0x91   :  { %v784_v32 = vmax.f32 %v782_v33, %v783_v53  ;;  %v790_v14 = vmax.f32 %v788_v49, %v789_v5  ;;  %v772_v22 = vmax.f32 %v770_v52, %v771_v18  ;;  %v778_v26 = vmax.f32 %v776_v34, %v777_v55 }
  0x92   :  { %v807_v35 = vrot.slane %v806_v42, 2  ;;  %v813_v28 = vrot.slane %v812_v44, 2  ;;  %v741_v47 = vmul.f32 %v1935_v10, %v1750_v11  ;;  %v742_v63 = vmul.f32 %v1935_v10, %v1753_v15 }
  0x93   :  { %v785_v17 = vrot.slane %v784_v32, 1  ;;  %v791_v59 = vrot.slane %v790_v14, 1  ;;  %v773_v1 = vrot.slane %v772_v22, 1  ;;  %v779_v24 = vrot.slane %v778_v26, 1 }
  0x94   :  { %v808_v2 = vmax.f32 %v806_v42, %v807_v35  ;;  %v814_v41 = vmax.f32 %v812_v44, %v813_v28  ;;  %v757_v48 = vadd.f32 %v741_v47, %v577_v54  ;;  %v1983_v29 = vadd.f32 %v742_v63, %v578_v61  ;;  %v2274_v47 = vld [vmem:[#allocation9_spill] sm:$0xff] }
  0x95   :  { %v786_v30 = vmax.f32 %v784_v32, %v785_v17  ;;  %v792_v25 = vmax.f32 %v790_v14, %v791_v59  ;;  %v774_v57 = vmax.f32 %v772_v22, %v773_v1  ;;  %v780_v13 = vmax.f32 %v778_v26, %v779_v24  ;;  %v2275_v59 = vld [vmem:[#allocation10_spill] sm:$0xff] }
  0x96   :  { %v809_v33 = vrot.slane %v808_v2, 1  ;;  %v815_v49 = vrot.slane %v814_v41, 1  ;;  %v793_v52 = vrot.slane %v757_v48, 4  ;;  %v799_v11 = vrot.slane %v1983_v29, 4 }
  0x97   :  { %v867_v15 = vsub.f32 %v1949_v39, %v786_v30  ;;  %v868_v34 = vsub.f32 %v1951_v45, %v792_v25  ;;  %v865_v38 = vsub.f32 %v1953_v40, %v774_v57  ;;  %v866_v43 = vsub.f32 %v1955_v46, %v780_v13  ;;  %v2277_v57 = vld [vmem:[#allocation14_spill] sm:$0xff]  ;;  %v2278_v13 = vld [vmem:[#allocation7_spill] sm:$0xff] }
  0x98   :  { %v810_v6 = vmax.f32 %v808_v2, %v809_v33  ;;  %v816_v8 = vmax.f32 %v814_v41, %v815_v49  ;;  %v794_v53 = vmax.f32 %v757_v48, %v793_v52  ;;  %v800_v5 = vmax.f32 %v1983_v29, %v799_v11  ;;  %v2276_v41 = vld [vmem:[#allocation13_spill] sm:$0xff]  ;;  %v2279_v11 = vld [vmem:[#allocation11_spill] sm:$0xff] }
  0x99   :  { %v885_v18 = vmul.f32 1.442695, %v867_v15  ;;  %v887_v55 = vmul.f32 1.442695, %v868_v34  ;;  %v881_v42 = vmul.f32 1.442695, %v865_v38  ;;  %v207_v44 = vmul.f32 %v1865_v0, %v1756_v19 }
  0x9a   :  { %v883_v54 = vmul.f32 1.442695, %v866_v43  ;;  %v871_v39 = vsub.f32 %v1963_v4, %v810_v6  ;;  %v872_v45 = vsub.f32 %v1965_v23, %v816_v8  ;;  %v795_v61 = vrot.slane %v794_v53, 2  ;;  %v2280_v34 = vld [vmem:[#allocation12_spill] sm:$0xff] }
  0x9b   :  { %1427 = vpow2.f32 %v885_v18  ;;  %v801_v40 = vrot.slane %v800_v5, 2  ;;  %v208_v46 = vmul.f32 %v1865_v0, %v1760_v31  ;;  %v223_v32 = vadd.f32 %v207_v44, %v1905_v36 }
  0x9c   :  { %1429 = vpow2.f32 %v887_v55  ;;  %v893_v14 = vmul.f32 1.442695, %v871_v39  ;;  %v895_v22 = vmul.f32 1.442695, %v872_v45  ;;  %v796_v26 = vmax.f32 %v794_v53, %v795_v61  ;;  %v2281_v53 = vld [vmem:[#allocation15_spill] sm:$0xff] }
  0x9d   :  { %1431 = vpow2.f32 %v881_v42  ;;  %v802_v35 = vmax.f32 %v800_v5, %v801_v40  ;;  %v224_v19 = vadd.f32 %v208_v46, %v1905_v36  ;;  %v387_v4 = vmul.f32 %v1867_v3, %v1763_v7  ;;  %v2282_v42 = vld [vmem:[#allocation16_spill] sm:$0xff] }
  0x9e   :  { %1433 = vpow2.f32 %v883_v54  ;;  %v797_v23 = vrot.slane %v796_v26, 1  ;;  %v388_v28 = vmul.f32 %v1867_v3, %v1766_v27  ;;  %v567_v31 = vmul.f32 %v1915_v21, %v2274_v47 }
  0x9f   :  { %1435 = vpow2.f32 %v893_v14  ;;  %v803_v63 = vrot.slane %v802_v35, 1  ;;  %v403_v17 = vadd.f32 %v387_v4, %v223_v32  ;;  %v568_v1 = vmul.f32 %v1915_v21, %v2275_v59 }
  0xa0   :  { %1437 = vpow2.f32 %v895_v22  ;;  %v798_v24 = vmax.f32 %v796_v26, %v797_v23  ;;  %v404_v2 = vadd.f32 %v388_v28, %v224_v19  ;;  %v747_v7 = vmul.f32 %v1935_v10, %v2276_v41 }
  0xa1   :  { %v804_v30 = vmax.f32 %v802_v35, %v803_v63  ;;  %v583_v25 = vadd.f32 %v567_v31, %v403_v17  ;;  %v748_v27 = vmul.f32 %v1935_v10, %v2277_v57  ;;  %v205_v33 = vmul.f32 %v1865_v0, %v2278_v13 }
  0xa2   :  { %v869_v49 = vsub.f32 %v757_v48, %v798_v24  ;;  %v584_v52 = vadd.f32 %v568_v1, %v404_v2  ;;  %v206_v15 = vmul.f32 %v1865_v0, %v2279_v11  ;;  %v385_v38 = vmul.f32 %v1867_v3, %v2280_v34 }
  0xa3   :  { %v870_v43 = vsub.f32 %v1983_v29, %v804_v30  ;;  %v2018_v6 = vadd.f32 %v747_v7, %v583_v25  ;;  %v221_v8 = vadd.f32 %v205_v33, %v1905_v36  ;;  %v386_v5 = vmul.f32 %v1867_v3, %v2281_v53 }
  0xa4   :  { %v889_v18 = vmul.f32 1.442695, %v869_v49  ;;  %v2023_v55 = vadd.f32 %v748_v27, %v584_v52  ;;  %v222_v48 = vadd.f32 %v206_v15, %v1905_v36  ;;  %v565_v44 = vmul.f32 %v1915_v21, %v2282_v42 }
  0xa5   :  { %v891_v54 = vmul.f32 1.442695, %v870_v43  ;;  %v829_v39 = vrot.slane %v2018_v6, 4  ;;  %v401_v45 = vadd.f32 %v385_v38, %v221_v8  ;;  %v566_v29 = vmul.f32 %v1915_v21, %v1830_v16 }
  0xa6   :  { %1439 = vpow2.f32 %v889_v18  ;;  %v835_v61 = vrot.slane %v2023_v55, 4  ;;  %v402_v40 = vadd.f32 %v386_v5, %v222_v48  ;;  %v745_v46 = vmul.f32 %v1935_v10, %v1833_v20 }
  0xa7   :  { %1441 = vpow2.f32 %v891_v54  ;;  %v830_v32 = vmax.f32 %v2018_v6, %v829_v39  ;;  %v581_v14 = vadd.f32 %v565_v44, %v401_v45  ;;  %v746_v22 = vmul.f32 %v1935_v10, %v1842_v51 }
  0xa8   :  { %v2037_v26 = vpop.eup %1427  ;;  %v836_v35 = vmax.f32 %v2023_v55, %v835_v61  ;;  %v582_v19 = vadd.f32 %v566_v29, %v402_v40  ;;  %v211_v16 = vmul.f32 %v1865_v0, %v1836_v37  ;;  %v2044_v4 = vmul.f32 %v1865_v0, %v1839_v58 }
  0xa9   :  { %v2046_v20 = vpop.eup %1429  ;;  %v925_v23 = vrot.slane %v2037_v26, 4  ;;  %v831_v28 = vrot.slane %v830_v32, 2  ;;  %v2049_v47 = vadd.f32 %v745_v46, %v581_v14  ;;  %v2053_v51 = vmul.f32 %v1867_v3, %v1845_v50 }
  0xaa   :  { %v2055_v31 = vpop.eup %1431  ;;  %v931_v63 = vrot.slane %v2046_v20, 4  ;;  %v837_v37 = vrot.slane %v836_v35, 2  ;;  %v2058_v17 = vadd.f32 %v746_v22, %v582_v19  ;;  %v2061_v58 = vadd.f32 %v211_v16, %v1905_v36 }
  0xab   :  { %v2063_v59 = vpop.eup %1433  ;;  %v926_v1 = vadd.f32 %v2037_v26, %v925_v23  ;;  %v913_v24 = vrot.slane %v2055_v31, 4  ;;  %v832_v2 = vmax.f32 %v830_v32, %v831_v28  ;;  %v817_v50 = vrot.slane %v2049_v47, 4 }
  0xac   :  { %v2068_v41 = vpop.eup %1435  ;;  %v932_v7 = vadd.f32 %v2046_v20, %v931_v63  ;;  %v919_v30 = vrot.slane %v2063_v59, 4  ;;  %v838_v25 = vmax.f32 %v836_v35, %v837_v37  ;;  %v823_v57 = vrot.slane %v2058_v17, 4 }
  0xad   :  { %v2073_v27 = vpop.eup %1437  ;;  %v927_v13 = vrot.slane %v926_v1, 2  ;;  %v914_v33 = vadd.f32 %v2055_v31, %v913_v24  ;;  %v949_v49 = vrot.slane %v2068_v41, 4  ;;  %v833_v52 = vrot.slane %v832_v2, 1 }
  0xae   :  { %v933_v11 = vrot.slane %v932_v7, 2  ;;  %v920_v15 = vadd.f32 %v2063_v59, %v919_v30  ;;  %v955_v34 = vrot.slane %v2073_v27, 4  ;;  %v839_v38 = vrot.slane %v838_v25, 1 }
  0xaf   :  { %v928_v43 = vadd.f32 %v927_v13, %v926_v1  ;;  %v915_v8 = vrot.slane %v914_v33, 2  ;;  %v950_v53 = vadd.f32 %v2068_v41, %v949_v49  ;;  %v834_v5 = vmax.f32 %v832_v2, %v833_v52 }
  0xb0   :  { %v934_v18 = vadd.f32 %v933_v11, %v932_v7  ;;  %v921_v48 = vrot.slane %v920_v15, 2  ;;  %v956_v42 = vadd.f32 %v2073_v27, %v955_v34  ;;  %v840_v44 = vmax.f32 %v838_v25, %v839_v38 }
  0xb1   :  { %v929_v54 = vrot.slane %v928_v43, 1  ;;  %v916_v39 = vadd.f32 %v915_v8, %v914_v33  ;;  %v951_v45 = vrot.slane %v950_v53, 2  ;;  %v875_v29 = vsub.f32 %v2018_v6, %v834_v5 }
  0xb2   :  { %v935_v61 = vrot.slane %v934_v18, 1  ;;  %v922_v40 = vadd.f32 %v921_v48, %v920_v15  ;;  %v957_v46 = vrot.slane %v956_v42, 2  ;;  %v876_v32 = vsub.f32 %v2023_v55, %v840_v44 }
  0xb3   :  { %v2083_v14 = vpop.eup %1439  ;;  %v930_v22 = vadd.f32 %v929_v54, %v928_v43  ;;  %v917_v35 = vrot.slane %v916_v39, 1  ;;  %v952_v19 = vadd.f32 %v951_v45, %v950_v53  ;;  %v901_v16 = vmul.f32 1.442695, %v875_v29 }
  0xb4   :  { %v2085_v23 = vpop.eup %1441  ;;  %v936_v28 = vadd.f32 %v935_v61, %v934_v18  ;;  %v923_v63 = vrot.slane %v922_v40, 1  ;;  %v958_v37 = vadd.f32 %v957_v46, %v956_v42  ;;  %v937_v1 = vrot.slane %v2083_v14, 4 }
  0xb5   :  { %1443 = vrcp.f32 %v930_v22  ;;  %v918_v6 = vadd.f32 %v917_v35, %v916_v39  ;;  %v953_v24 = vrot.slane %v952_v19, 1  ;;  %v943_v2 = vrot.slane %v2085_v23, 4  ;;  %v2283_v22 = vld [vmem:[#allocation17_spill] sm:$0xff]  ;;  %v2284_v35 = vld [vmem:[#allocation4_spill] sm:$0xff] }
  0xb6   :  { %1445 = vrcp.f32 %v936_v28  ;;  %v924_v55 = vadd.f32 %v923_v63, %v922_v40  ;;  %v959_v7 = vrot.slane %v958_v37, 1  ;;  %v938_v30 = vadd.f32 %v2083_v14, %v937_v1  ;;  %v2285_v1 = vld [vmem:[#allocation18_spill] sm:$0xff] }
  0xb7   :  { %1447 = vrcp.f32 %v918_v6  ;;  %v954_v25 = vadd.f32 %v953_v24, %v952_v19  ;;  %v944_v13 = vadd.f32 %v2085_v23, %v943_v2  ;;  %v903_v33 = vmul.f32 1.442695, %v876_v32 }
  0xb8   :  { %1449 = vrcp.f32 %v924_v55  ;;  %v960_v49 = vadd.f32 %v959_v7, %v958_v37  ;;  %v939_v52 = vrot.slane %v938_v30, 2  ;;  %v818_v11 = vmax.f32 %v2049_v47, %v817_v50 }
  0xb9   :  { %1451 = vrcp.f32 %v954_v25  ;;  %v945_v15 = vrot.slane %v944_v13, 2  ;;  %v824_v34 = vmax.f32 %v2058_v17, %v823_v57  ;;  %v228_v38 = vadd.f32 %v2044_v4, %v1905_v36 }
  0xba   :  { %1453 = vrcp.f32 %v960_v49  ;;  %v940_v43 = vadd.f32 %v939_v52, %v938_v30  ;;  %v819_v8 = vrot.slane %v818_v11, 2  ;;  %v392_v53 = vmul.f32 %v1867_v3, %v1848_v9 }
  0xbb   :  { %v946_v5 = vadd.f32 %v945_v15, %v944_v13  ;;  %1455 = vpow2.f32 %v901_v16  ;;  %v825_v18 = vrot.slane %v824_v34, 2  ;;  %v407_v48 = vadd.f32 %v2053_v51, %v2061_v58  ;;  %v2286_v13 = vld [vmem:[#allocation5_spill] sm:$0xff] }
  0xbc   :  { %v941_v50 = vrot.slane %v940_v43, 1  ;;  %1457 = vpow2.f32 %v903_v33  ;;  %v820_v42 = vmax.f32 %v818_v11, %v819_v8  ;;  %v408_v44 = vadd.f32 %v392_v53, %v228_v38 }
  0xbd   :  { %v947_v57 = vrot.slane %v946_v5, 1  ;;  %v826_v54 = vmax.f32 %v824_v34, %v825_v18  ;;  %v571_v4 = vmul.f32 %v1915_v21, %v1854_v56  ;;  %v572_v39 = vmul.f32 %v1915_v21, %v1857_v60 }
  0xbe   :  { %v942_v45 = vadd.f32 %v941_v50, %v940_v43  ;;  %v821_v9 = vrot.slane %v820_v42, 1  ;;  %v751_v29 = vmul.f32 %v1935_v10, %v1860_v62  ;;  %v752_v51 = vmul.f32 %v1935_v10, %v1863_v12 }
  0xbf   :  { %v948_v58 = vadd.f32 %v947_v57, %v946_v5  ;;  %v827_v61 = vrot.slane %v826_v54, 1  ;;  %v587_v40 = vadd.f32 %v571_v4, %v407_v48  ;;  %v588_v46 = vadd.f32 %v572_v39, %v408_v44  ;;  %v2287_v48 = vld [vmem:[#allocation19_spill] sm:$0xff]  ;;  %v2289_v4 = vld [vmem:[#allocation20_spill] sm:$0xff] }
  0xc0   :  { %1459 = vrcp.f32 %v942_v45  ;;  %v822_v32 = vmax.f32 %v820_v42, %v821_v9  ;;  %v209_v56 = vmul.f32 %v1865_v0, %v2283_v22  ;;  %v210_v60 = vmul.f32 %v1865_v0, %v2284_v35  ;;  %v2288_v42 = vld [vmem:[#allocation6_spill] sm:$0xff] }
  0xc1   :  { %1461 = vrcp.f32 %v948_v58  ;;  %v828_v19 = vmax.f32 %v826_v54, %v827_v61  ;;  %v2111_v16 = vadd.f32 %v751_v29, %v587_v40  ;;  %v2113_v62 = vadd.f32 %v752_v51, %v588_v46 }
  0xc2   :  { %v1444_v28 = vpop.eup %1443  ;;  %v873_v12 = vsub.f32 %v2049_v47, %v822_v32  ;;  %v225_v63 = vadd.f32 %v209_v56, %v1905_v36  ;;  %v226_v37 = vadd.f32 %v210_v60, %v1905_v36  ;;  %v389_v6 = vmul.f32 %v1867_v3, %v2285_v1 }
  0xc3   :  { %v1446_v24 = vpop.eup %1445  ;;  %v1027_v2 = vmul.f32 %v1444_v28, %v2037_v26  ;;  %v874_v0 = vsub.f32 %v2058_v17, %v828_v19  ;;  %v853_v55 = vrot.slane %v2111_v16, 4  ;;  %v859_v7 = vrot.slane %v2113_v62, 4 }
  0xc4   :  { %v1448_v30 = vpop.eup %1447  ;;  %v1028_v25 = vmul.f32 %v1446_v24, %v2046_v20  ;;  %v897_v47 = vmul.f32 1.442695, %v873_v12  ;;  %v390_v33 = vmul.f32 %v1867_v3, %v2286_v13  ;;  %v405_v36 = vadd.f32 %v389_v6, %v225_v63 }
  0xc5   :  { %v1450_v49 = vpop.eup %1449  ;;  %v1025_v52 = vmul.f32 %v1448_v30, %v2055_v31  ;;  %v899_v11 = vmul.f32 1.442695, %v874_v0  ;;  %v854_v26 = vmax.f32 %v2111_v16, %v853_v55  ;;  %v860_v17 = vmax.f32 %v2113_v62, %v859_v7 }
  0xc6   :  { %v1452_v15 = vpop.eup %1451  ;;  %v1044_v34 = vadd.f32 %v1028_v25, %v1027_v2  ;;  %v1026_v38 = vmul.f32 %v1450_v49, %v2063_v59  ;;  %1463 = vpow2.f32 %v897_v47  ;;  %v406_v43 = vadd.f32 %v390_v33, %v226_v37 }
  0xc7   :  { %v1454_v20 = vpop.eup %1453  ;;  %v1031_v8 = vmul.f32 %v1452_v15, %v2068_v41  ;;  %1465 = vpow2.f32 %v899_v11  ;;  %v855_v3 = vrot.slane %v854_v26, 2  ;;  %v861_v53 = vrot.slane %v860_v17, 2 }
  0xc8   :  { %v2132_v5 = vpop.eup %1455  ;;  %1045 = vadd.xlane.f32.xlu0 %v1044_v34  ;;  %v1041_v31 = vadd.f32 %v1026_v38, %v1025_v52  ;;  %v1032_v18 = vmul.f32 %v1454_v20, %v2073_v27  ;;  %v569_v50 = vmul.f32 %v1915_v21, %v2287_v48  ;;  %v570_v59 = vmul.f32 %v1915_v21, %v2288_v42  ;;  %v2290_v21 = vld [vmem:[#allocation21_spill] sm:$0xff] }
  0xc9   :  { %v2139_v44 = vpop.eup %1457  ;;  %v973_v57 = vrot.slane %v2132_v5, 4  ;;  %v856_v41 = vmax.f32 %v854_v26, %v855_v3  ;;  %v862_v54 = vmax.f32 %v860_v17, %v861_v53  ;;  %v749_v39 = vmul.f32 %v1935_v10, %v2289_v4 }
  0xca   :  { %1042 = vadd.xlane.f32.xlu1 %v1041_v31  ;;  %v1050_v45 = vadd.f32 %v1032_v18, %v1031_v8  ;;  %v979_v9 = vrot.slane %v2139_v44, 4  ;;  %v585_v27 = vadd.f32 %v569_v50, %v405_v36  ;;  %v586_v29 = vadd.f32 %v570_v59, %v406_v43 }
  0xcb   :  { %v974_v51 = vadd.f32 %v2132_v5, %v973_v57  ;;  %v857_v58 = vrot.slane %v856_v41, 1  ;;  %v863_v61 = vrot.slane %v862_v54, 1  ;;  %v750_v40 = vmul.f32 %v1935_v10, %v2290_v21 }
  0xcc   :  { %1051 = vadd.xlane.f32.xlu0 %v1050_v45  ;;  %v980_v46 = vadd.f32 %v2139_v44, %v979_v9  ;;  %v765_v32 = vadd.f32 %v749_v39, %v585_v27 }
  0xcd   :  { %v1460_v22 = vpop.eup %1459  ;;  %v975_v56 = vrot.slane %v974_v51, 2  ;;  %v858_v35 = vmax.f32 %v856_v41, %v857_v58  ;;  %v864_v60 = vmax.f32 %v862_v54, %v863_v61  ;;  %v766_v19 = vadd.f32 %v750_v40, %v586_v29 }
  0xce   :  { %v1462_v28 = vpop.eup %1461  ;;  %v1029_v12 = vmul.f32 %v1460_v22, %v2083_v14  ;;  %v981_v63 = vrot.slane %v980_v46, 2  ;;  %v841_v37 = vrot.slane %v765_v32, 4 }
  0xcf   :  { %v1030_v1 = vmul.f32 %v1462_v28, %v2085_v23  ;;  %v976_v6 = vadd.f32 %v975_v56, %v974_v51  ;;  %v879_v24 = vsub.f32 %v2111_v16, %v858_v35  ;;  %v880_v10 = vsub.f32 %v2113_v62, %v864_v60 }
  0xd0   :  { %v982_v2 = vadd.f32 %v981_v63, %v980_v46  ;;  %v842_v0 = vmax.f32 %v765_v32, %v841_v37  ;;  %v847_v55 = vrot.slane %v766_v19, 4 }
  0xd1   :  { %v1047_v7 = vadd.f32 %v1030_v1, %v1029_v12  ;;  %v977_v30 = vrot.slane %v976_v6, 1  ;;  %v909_v25 = vmul.f32 1.442695, %v879_v24  ;;  %v911_v47 = vmul.f32 1.442695, %v880_v10 }
  0xd2   :  { %v983_v13 = vrot.slane %v982_v2, 1  ;;  %v843_v33 = vrot.slane %v842_v0, 2  ;;  %v848_v36 = vmax.f32 %v766_v19, %v847_v55 }
  0xd3   :  { %v1464_v14 = vpop.eup %1463  ;;  %1048 = vadd.xlane.f32.xlu1 %v1047_v7  ;;  %v978_v49 = vadd.f32 %v977_v30, %v976_v6  ;;  %1467 = vpow2.f32 %v909_v25 }
  0xd4   :  { %v1466_v23 = vpop.eup %1465  ;;  %v984_v52 = vadd.f32 %v983_v13, %v982_v2  ;;  %v961_v11 = vrot.slane %v1464_v14, 4  ;;  %1469 = vpow2.f32 %v911_v47  ;;  %v844_v16 = vmax.f32 %v842_v0, %v843_v33 }
  0xd5   :  { %1471 = vrcp.f32 %v978_v49  ;;  %v967_v62 = vrot.slane %v1466_v23, 4  ;;  %v849_v26 = vrot.slane %v848_v36, 2 }
  0xd6   :  { %1473 = vrcp.f32 %v984_v52  ;;  %v962_v17 = vadd.f32 %v1464_v14, %v961_v11  ;;  %v845_v15 = vrot.slane %v844_v16, 1 }
  0xd7   :  { %v968_v34 = vadd.f32 %v1466_v23, %v967_v62  ;;  %v850_v38 = vmax.f32 %v848_v36, %v849_v26 }
  0xd8   :  { %v963_v43 = vrot.slane %v962_v17, 2  ;;  %v846_v20 = vmax.f32 %v844_v16, %v845_v15  ;;  %v1496_v15 = vld [vmem:[%s2246_s0 + $0x18] sm:$0xff] }
  0xd9   :  { %v969_v8 = vrot.slane %v968_v34, 2  ;;  %v851_v3 = vrot.slane %v850_v38, 1 }
  0xda   :  { %v964_v53 = vadd.f32 %v963_v43, %v962_v17  ;;  %v877_v31 = vsub.f32 %v765_v32, %v846_v20  ;;  %v1249_v20 = vsel %vm1233_vm0, %v1496_v15, 0.0 }
  0xdb   :  { %v970_v18 = vadd.f32 %v969_v8, %v968_v34  ;;  %v852_v48 = vmax.f32 %v850_v38, %v851_v3  ;;  %v1220_v34 = vcombine.high %v1496_v15, %v1496_v15  ;;  %v1497_v3 = vld [vmem:[%s2246_s0 + $0x28] sm:$0xff] }
  0xdc   :  { %v965_v50 = vrot.slane %v964_v53, 1  ;;  %v905_v42 = vmul.f32 1.442695, %v877_v31 }
  0xdd   :  { %v971_v59 = vrot.slane %v970_v18, 1  ;;  %v878_v57 = vsub.f32 %v766_v19, %v852_v48  ;;  %v1250_v8 = vsel %vm1233_vm0, %v1220_v34, 0.0  ;;  %v1259_v48 = vsel %vm1233_vm0, %v1497_v3, 0.0 }
  0xde   :  { %v966_v41 = vadd.f32 %v965_v50, %v964_v53  ;;  %1475 = vpow2.f32 %v905_v42  ;;  %v1222_v53 = vcombine.high %v1497_v3, %v1497_v3  ;;  %v1251_v31 = vadd.f32 %v1250_v8, %v1249_v20  ;;  %v2291_v42 = vld [vmem:[#allocation8_spill] sm:$0xff] }
  0xdf   :  { %v972_v54 = vadd.f32 %v971_v59, %v970_v18  ;;  %v907_v4 = vmul.f32 1.442695, %v878_v57  ;;  %v1224_v59 = vcombine.high %v2291_v42, %v2291_v42  ;;  %v1498_v57 = vld [vmem:[%s2246_s0] sm:$0xff] }
  0xe0   :  { %v1468_v39 = vpop.eup %1467  ;;  %1477 = vrcp.f32 %v966_v41  ;;  %v1260_v50 = vsel %vm1233_vm0, %v1222_v53, 0.0  ;;  %v1217_v41 = vcombine.high %v1498_v57, %v1498_v57 }
  0xe1   :  { %v1470_v45 = vpop.eup %1469  ;;  %1479 = vrcp.f32 %v972_v54  ;;  %v997_v9 = vrot.slane %v1468_v39, 4 }
  0xe2   :  { %v1472_v27 = vpop.eup %1471  ;;  %v1003_v29 = vrot.slane %v1470_v45, 4  ;;  %1481 = vpow2.f32 %v907_v4  ;;  %v1261_v4 = vadd.f32 %v1260_v50, %v1259_v48 }
  0xe3   :  { %v1474_v51 = vpop.eup %1473  ;;  %v1035_v58 = vmul.f32 %v1472_v27, %v2132_v5  ;;  %v998_v61 = vadd.f32 %v1468_v39, %v997_v9  ;;  %v1270_v9 = vsel %vm1233_vm0, %v1224_v59, 0.0 }
  0xe4   :  { %v1036_v21 = vmul.f32 %v1474_v51, %v2139_v44  ;;  %v1004_v40 = vadd.f32 %v1470_v45, %v1003_v29  ;;  %v1234_v29 = vsel %vm1233_vm0, %v1498_v57, 0.0  ;;  %v1235_v51 = vsel %vm1233_vm0, %v1217_v41, 0.0 }
  0xe5   :  { %v999_v46 = vrot.slane %v998_v61, 2 }
  0xe6   :  { %v1056_v32 = vadd.f32 %v1036_v21, %v1035_v58  ;;  %v1005_v22 = vrot.slane %v1004_v40, 2  ;;  %v1499_v58 = vld [vmem:[%s2246_s0 + $0x10] sm:$0xff] }
  0xe7   :  { %v1000_v56 = vadd.f32 %v999_v46, %v998_v61  ;;  %v1219_v61 = vcombine.high %v1499_v58, %v1499_v58  ;;  %v1236_v46 = vadd.f32 %v1235_v51, %v1234_v29 }
  0xe8   :  { %1057 = vadd.xlane.f32.xlu0 %v1056_v32  ;;  %v1006_v35 = vadd.f32 %v1005_v22, %v1004_v40  ;;  %v1244_v32 = vsel %vm1233_vm0, %v1499_v58, 0.0 }
  0xe9   :  { %v1001_v60 = vrot.slane %v1000_v56, 1  ;;  %v1245_v22 = vsel %vm1233_vm0, %v1219_v61, 0.0 }
  0xea   :  { %v1007_v19 = vrot.slane %v1006_v35, 1 }
  0xeb   :  { %v1476_v28 = vpop.eup %1475  ;;  %v1002_v12 = vadd.f32 %v1001_v60, %v1000_v56  ;;  %v1500_v56 = vld [vmem:[%s2246_s0 + $0x20] sm:$0xff]  ;;  %v1246_v60 = vadd.f32 %v1245_v22, %v1244_v32 }
  0xec   :  { %v1008_v63 = vadd.f32 %v1007_v19, %v1006_v35  ;;  %v985_v37 = vrot.slane %v1476_v28, 4  ;;  %v1221_v35 = vcombine.high %v1500_v56, %v1500_v56  ;;  %v1254_v19 = vsel %vm1233_vm0, %v1500_v56, 0.0 }
  0xed   :  { %v1478_v1 = vpop.eup %1477  ;;  %1483 = vrcp.f32 %v1002_v12  ;;  %v1501_v12 = vld [vmem:[%s2246_s0 + $0x30] sm:$0xff] }
  0xee   :  { %v1480_v6 = vpop.eup %1479  ;;  %v1033_v5 = vmul.f32 %v1478_v1, %v1464_v14  ;;  %1485 = vrcp.f32 %v1008_v63  ;;  %v986_v24 = vadd.f32 %v1476_v28, %v985_v37  ;;  %v1495_v14 = vld [vmem:[%s2246_s0 + $0x8] sm:$0xff]  ;;  %v1223_v63 = vcombine.high %v1501_v12, %v1501_v12 }
  0xef   :  { %v1482_v44 = vpop.eup %1481  ;;  %v1034_v10 = vmul.f32 %v1480_v6, %v1466_v23  ;;  %v1218_v49 = vcombine.high %v1495_v14, %v1495_v14  ;;  %v1239_v26 = vsel %vm1233_vm0, %v1495_v14, 0.0  ;;  %v1264_v1 = vsel %vm1233_vm0, %v1501_v12, 0.0 }
  0xf0   :  { %v987_v2 = vrot.slane %v986_v24, 2  ;;  %v991_v0 = vrot.slane %v1482_v44, 4  ;;  %v1265_v6 = vsel %vm1233_vm0, %v1223_v63, 0.0 }
  0xf1   :  { %v1053_v55 = vadd.f32 %v1034_v10, %v1033_v5  ;;  %v1240_v17 = vsel %vm1233_vm0, %v1218_v49, 0.0  ;;  %v1266_v5 = vadd.f32 %v1265_v6, %v1264_v1  ;;  %v1397_v10 = vld [vmem:[%s2248_s4] ss:$0 sm:$0xff] }
  0xf2   :  { %v988_v7 = vadd.f32 %v987_v2, %v986_v24  ;;  %v992_v30 = vadd.f32 %v1482_v44, %v991_v0  ;;  %v1241_v43 = vadd.f32 %v1240_v17, %v1239_v26  ;;  %v1506_v24 = vmov 0.0  }
  0xf3   :  { %1054 = vadd.xlane.f32.xlu1 %v1053_v55  ;;  %1401 = vmatprep.subr.mxu0 %v1506_v24 }
  0xf4   :  { %v989_v25 = vrot.slane %v988_v7, 1  ;;  %v993_v47 = vrot.slane %v992_v30, 2  ;;  %1403 = vmatprep.mubr.msk.f32.mxu0 %vm1507_vm1, %v1506_v24 }
  0xf6   :  { %v990_v13 = vadd.f32 %v989_v25, %v988_v7  ;;  %v994_v33 = vadd.f32 %v993_v47, %v992_v30  ;;  %v2292_v7 = vlaneseq  ;;  %v2293_v47 = vld [vmem:[#allocation3_spill] sm:$0xff] }
  0xf8   :  { %v995_v36 = vrot.slane %v994_v33, 1  ;;  %1487 = vrcp.f32 %v990_v13  ;;  %v1084_v30 = vand.u32 127, %v2292_v7 }
  0xfa   :  { %v1484_v52 = vpop.eup %1483  ;;  %v996_v11 = vadd.f32 %v995_v36, %v994_v33  ;;  %v2203_v13 = vsub.s32 %v1084_v30, %v2293_v47 }
  0xfb   :  { %v1486_v23 = vpop.eup %1485  ;;  %v1039_v16 = vmul.f32 %v1484_v52, %v1468_v39 }
  0xfc   :  { %v1040_v62 = vmul.f32 %v1486_v23, %v1470_v45  ;;  %1489 = vrcp.f32 %v996_v11  ;;  %v1269_v45 = vsel %vm1233_vm0, %v2291_v42, 0.0 }
  0xfd   :  { %v1271_v40 = vadd.f32 %v1270_v9, %v1269_v45 }
  0xfe   :  { %v1062_v38 = vadd.f32 %v1040_v62, %v1039_v16 }
 0x100   :  { %1063 = vadd.xlane.f32.xlu0 %v1062_v38 }
 0x104   :  { %1242 = vadd.xlane.f32.xlu0 %v1241_v43 }
 0x105   :  { %v1488_v18 = vpop.eup %1487 }
 0x106   :  { %v1037_v54 = vmul.f32 %v1488_v18, %v1476_v28  ;;  %v1255_v28 = vsel %vm1233_vm0, %v1221_v35, 0.0 }
 0x107   :  { %v1256_v37 = vadd.f32 %v1255_v28, %v1254_v19 }
 0x108   :  { %1252 = vadd.xlane.f32.xlu0 %v1251_v31 }
 0x109   :  { %v1490_v39 = vpop.eup %1489 }
 0x10a   :  { %v1038_v27 = vmul.f32 %v1490_v39, %v1482_v44  ;;  %v1074_v44 = vld [vmem:[%s2247_s3] sm:$0xff] }
 0x10b   :  { %1402 = vmatpush3.msra.mxu0 %v1074_v44 }
 0x10c   :  { %v1059_v21 = vadd.f32 %v1038_v27, %v1037_v54  ;;  %1262 = vadd.xlane.f32.xlu0 %v1261_v4 }
 0x10e   :  { %1060 = vadd.xlane.f32.xlu1 %v1059_v21 }
 0x110   :  { %1272 = vadd.xlane.f32.xlu0 %v1271_v40 }
 0x112   :  { %1237 = vadd.xlane.f32.xlu1 %v1236_v46 }
 0x116   :  { %1247 = vadd.xlane.f32.xlu1 %v1246_v60 }
 0x11a   :  { %1257 = vadd.xlane.f32.xlu1 %v1256_v37 }
 0x11e   :  { %1267 = vadd.xlane.f32.xlu1 %v1266_v5 }
 0x12f   :  { %1289 = vbcast.lane.b32.xlu1 %v1397_v10, 256 }
 0x151   :  { %v1046_v2 = vpop.xlane.xlu0 %1045 }
 0x152   :  { %v1067_v33 = vmul.f32 0.00390625, %v1046_v2 }
 0x153   :  { %v1043_v0 = vpop.xlane.xlu1 %1042 }
 0x154   :  { %v1066_v36 = vmul.f32 0.00390625, %v1043_v0  ;;  %v1092_v11 = vrot.slane %v1067_v33, %v2203_v13 }
 0x155   :  { %v1052_v55 = vpop.xlane.xlu0 %1051 }
 0x156   :  { %v1088_v23 = vrot.slane %v1066_v36, %v2203_v13  ;;  %v1069_v16 = vmul.f32 0.00390625, %v1052_v55 }
 0x158   :  { %v1118_v15 = vsel %vm1117_vm2, %v1092_v11, %v1088_v23  ;;  %v1100_v34 = vrot.slane %v1069_v16, %v2203_v13 }
 0x15c   :  { %v1049_v25 = vpop.xlane.xlu1 %1048 }
 0x15d   :  { %v1068_v14 = vmul.f32 0.00390625, %v1049_v25 }
 0x15f   :  { %v1096_v62 = vrot.slane %v1068_v14, %v2203_v13 }
 0x161   :  { %v1120_v43 = vsel %vm1119_vm3, %v1096_v62, %v1118_v15 }
 0x162   :  { %v1122_v53 = vsel %vm1121_vm4, %v1100_v34, %v1120_v43 }
 0x171   :  { %v1058_v49 = vpop.xlane.xlu0 %1057 }
 0x172   :  { %v1071_v38 = vmul.f32 0.00390625, %v1058_v49 }
 0x174   :  { %v1108_v3 = vrot.slane %v1071_v38, %v2203_v13 }
 0x17c   :  { %v1055_v52 = vpop.xlane.xlu1 %1054 }
 0x17d   :  { %v1070_v26 = vmul.f32 0.00390625, %v1055_v52 }
 0x17f   :  { %v1104_v20 = vrot.slane %v1070_v26, %v2203_v13 }
 0x181   :  { %v1124_v18 = vsel %vm1123_vm5, %v1104_v20, %v1122_v53 }
 0x182   :  { %v1126_v59 = vsel %vm1125_vm6, %v1108_v3, %v1124_v18 }
 0x189   :  { %v1064_v17 = vpop.xlane.xlu0 %1063 }
 0x18a   :  { %v1073_v8 = vmul.f32 0.00390625, %v1064_v17 }
 0x18c   :  { %v1116_v50 = vrot.slane %v1073_v8, %v2203_v13  ;;  %v11_v8 = vstv %s2249_s5 }
 0x18d   :  { %v1243_v45 = vpop.xlane.xlu0 %1242  ;;  %12 = vst [vmem:[#allocation2] sm:$0x1] %v11_v8 }
 0x18e   :  { %v1275_v27 = vmul.f32 0.00390625, %v1243_v45 }
 0x191   :  { %v1253_v61 = vpop.xlane.xlu0 %1252 }
 0x192   :  { %v1277_v46 = vmul.f32 0.00390625, %v1253_v61 }
 0x194   :  { %v1398_v3 = vld [vmem:[#allocation2] ss:$0 sm:$0xff] }
 0x195   :  { %v1263_v35 = vpop.xlane.xlu0 %1262 }
 0x196   :  { %v1279_v60 = vmul.f32 0.00390625, %v1263_v35 }
 0x197   :  { %v1061_v31 = vpop.xlane.xlu1 %1060 }
 0x198   :  { %v1072_v48 = vmul.f32 0.00390625, %v1061_v31 }
 0x199   :  { %v1273_v63 = vpop.xlane.xlu0 %1272 }
 0x19a   :  { %v1112_v42 = vrot.slane %v1072_v48, %v2203_v13  ;;  %v1281_v37 = vmul.f32 0.00390625, %v1273_v63 }
 0x19b   :  { %v1238_v57 = vpop.xlane.xlu1 %1237 }
 0x19c   :  { %v1128_v41 = vsel %vm1127_vm7, %v1112_v42, %v1126_v59  ;;  %v1274_v29 = vmul.f32 0.00390625, %v1238_v57 }
 0x19d   :  { %v1130_v54 = vsel %vm1129_vm8, %v1116_v50, %v1128_v41 }
 0x19e   :  { %1404 = vmatmul.mubr.msk.f32.vlgmr.msra.gmra.mxu0 %vm1131_vm9, %v1130_v54 }
 0x19f   :  { %v1248_v4 = vpop.xlane.xlu1 %1247 }
 0x1a0   :  { %v1276_v51 = vmul.f32 0.00390625, %v1248_v4 }
 0x1a3   :  { %v1258_v39 = vpop.xlane.xlu1 %1257 }
 0x1a4   :  { %v1278_v22 = vmul.f32 0.00390625, %v1258_v39 }
 0x1a7   :  { %v1268_v9 = vpop.xlane.xlu1 %1267 }
 0x1a8   :  { %v1280_v28 = vmul.f32 0.00390625, %v1268_v9 }
 0x1ab   :  { %v1290_v58 = vpop.permute.xlu1 %1289 }
 0x1ac   :  { %v1293_v21 = vmul.f32 %v1290_v58, %v1275_v27  ;;  %v1292_v40 = vmul.f32 %v1290_v58, %v1274_v29  ;;  %v1294_v32 = vmul.f32 %v1290_v58, %v1276_v51  ;;  %v1295_v56 = vmul.f32 %v1290_v58, %v1277_v46 }
 0x1ad   :  { %v1296_v19 = vmul.f32 %v1290_v58, %v1278_v22  ;;  %v1297_v12 = vmul.f32 %v1290_v58, %v1279_v60  ;;  %v1298_v1 = vmul.f32 %v1290_v58, %v1280_v28  ;;  %v1299_v6 = vmul.f32 %v1290_v58, %v1281_v37 }
 0x1ae   :  { %1312 = vperm.xlu1 %1418, %v1293_v21   ;;  %1309 = vperm.xlu0 %1417, %v1292_v40  }
 0x1b2   :  { %1315 = vperm.xlu1 %1418, %v1294_v32  }
 0x1b6   :  { %1318 = vperm.xlu1 %1418, %v1295_v56  }
 0x1ba   :  { %1321 = vperm.xlu1 %1418, %v1296_v19  }
 0x1be   :  { %1324 = vperm.xlu1 %1418, %v1297_v12  }
 0x1c2   :  { %1327 = vperm.xlu1 %1418, %v1298_v1  }
 0x1c6   :  { %1330 = vperm.xlu1 %1418, %v1299_v6  }
 0x229   :  { %v1313_v5 = vpop.permute.xlu1 %1312  ;;  %v1310_v24 = vpop.permute.xlu0 %1309 }
 0x22a   :  { %v1339_v10 = vrot.slane %v1313_v5, %v2203_v13  ;;  %v1335_v2 = vrot.slane %v1310_v24, %v2203_v13 }
 0x22c   :  { %v1364_v7 = vsel %vm1117_vm2, %v1339_v10, %v1335_v2 }
 0x22d   :  { %v1316_v44 = vpop.permute.xlu1 %1315 }
 0x22e   :  { %v1343_v0 = vrot.slane %v1316_v44, %v2203_v13 }
 0x230   :  { %v1365_v47 = vsel %vm1119_vm3, %v1343_v0, %v1364_v7 }
 0x231   :  { %v1319_v55 = vpop.permute.xlu1 %1318 }
 0x232   :  { %v1347_v30 = vrot.slane %v1319_v55, %v2203_v13 }
 0x234   :  { %v1366_v36 = vsel %vm1121_vm4, %v1347_v30, %v1365_v47 }
 0x235   :  { %v1322_v25 = vpop.permute.xlu1 %1321 }
 0x236   :  { %v1351_v33 = vrot.slane %v1322_v25, %v2203_v13 }
 0x238   :  { %v1367_v52 = vsel %vm1123_vm5, %v1351_v33, %v1366_v36 }
 0x239   :  { %v1325_v14 = vpop.permute.xlu1 %1324 }
 0x23a   :  { %v1355_v49 = vrot.slane %v1325_v14, %v2203_v13 }
 0x23c   :  { %v1368_v16 = vsel %vm1125_vm6, %v1355_v49, %v1367_v52 }
 0x23d   :  { %v1328_v11 = vpop.permute.xlu1 %1327 }
 0x23e   :  { %v1359_v23 = vrot.slane %v1328_v11, %v2203_v13 }
 0x240   :  { %v1369_v26 = vsel %vm1127_vm7, %v1359_v23, %v1368_v16 }
 0x241   :  { %v1331_v62 = vpop.permute.xlu1 %1330 }
 0x242   :  { %v1363_v17 = vrot.slane %v1331_v62, %v2203_v13 }
 0x244   :  { %v1370_v15 = vsel %vm1129_vm8, %v1363_v17, %v1369_v26 }
 0x245   :  { %v1373_v34 = vsel %vm1372_vm10, %v1370_v15, 0.0 }
 0x246   :  { %1374 = vadd.xlane.f32.xlu0 %v1373_v34 }
 0x25e   :  { %v1200_v38 = vpop.f32.mrf.mxu0 }
 0x25f   :  { %v1205_v43 = vsel %vm1204_vm11, %v1200_v38, -inf }
 0x260   :  { %v1405_v20 = vpop.f32.mrf.mxu0  ;;  %1206 = vmax.xlane.f32.xlu1 %v1205_v43 }
 0x2cf   :  { %v1375_v53 = vpop.xlane.xlu0 %1374 }
 0x2d0   :  { %v1383_v31 = vadd.f32 %v1398_v3, %v1375_v53 }
 0x2d2   :  { %1385 = vrot.lane.b32.xlu1 %v1383_v31, %s1508_s30 }
 0x2e9   :  { %v1207_v13 = vpop.xlane.xlu1 %1206 }
 0x2ea   :  { %v1208_v18 = vsub.f32 %v1200_v38, %v1207_v13 }
 0x2ec   :  { %v1209_v48 = vmul.f32 1.442695, %v1208_v18 }
 0x2ee   :  { %1491 = vpow2.f32 %v1209_v48 }
 0x2fb   :  { %v1492_v50 = vpop.eup %1491 }
 0x2fc   :  { %v1211_v42 = vsel %vm1204_vm11, %v1492_v50, 0.0 }
 0x2fd   :  { %1212 = vadd.xlane.f32.xlu0 %v1211_v42 }
 0x344   :  { %v1386_v4 = vpop.permute.xlu1 %1385 }
 0x386   :  { %v1213_v59 = vpop.xlane.xlu0 %1212 }
 0x387   :  { %1493 = vlog2.f32 %v1213_v59 }
 0x394   :  { %v1494_v57 = vpop.eup %1493 }
 0x395   :  { %v1215_v41 = vmul.f32 0.6931472, %v1494_v57 }
 0x397   :  { %v1216_v54 = vsub.f32 %v1208_v18, %v1215_v41 }
 0x399   :  { %v1388_v39 = vsel %vm1204_vm11, %v1216_v54, %v1386_v4 }
 0x39a   :  { %v1390_v45 = vsel %vm1389_vm12, %v1388_v39, 0.0 }
 0x39b   :  { %1391 = vst [vmem:[%s2250_s6] sm:$0xff] %v1390_v45 }

</bundles_post_ra>
